<compile_context>
chip_gen: v6e
topology: v6e:2x2x1
jax: 0.10.0
libtpu: 0.0.40
codegen_flags: <defaults>
</compile_context>

<pallas_src>
import functools

import jax
import jax.numpy as jnp
from jax.experimental import pallas as pl
from jax.experimental.pallas import tpu as pltpu


# ---------------------------------------------------------------------------
# static helpers (trace-time python ints only)
# ---------------------------------------------------------------------------
def _round_up(a, b):
    return (a + b - 1) // b * b


def _cdiv(a, b):
    return (a + b - 1) // b


def _pick_tile_128(total, cap):
    """Largest multiple of 128 that is <= cap and divides `total`
    (`total` must already be a multiple of 128)."""
    t = max(128, (min(total, cap) // 128) * 128)
    while total % t != 0:
        t -= 128
    return t


def _pick_k_tile(K, cap):
    """K tiling that avoids padding the activation whenever possible.

    Returns (tk, k_pad): prefers tk == K (single K block, no reduction grid
    axis), then a multiple-of-128 divisor of K, and only as a last resort a
    padded K."""
    if K <= cap:
        return K, K
    t = (min(K, cap) // 128) * 128
    while t >= 128:
        if K % t == 0:
            return t, K
        t -= 128
    t = max(128, (cap // 128) * 128)
    return t, _round_up(K, t)


# ---------------------------------------------------------------------------
# kernels (shared between both paths; blocks are always 2-D)
# ---------------------------------------------------------------------------
def _linear_kernel(x_ref, w_ref, b_ref, o_ref):
    """Single-K-block case: (tm, K) @ (K, tn) + bias, f32 MXU accumulation."""
    o_ref[...] = (
        jnp.dot(x_ref[...], w_ref[...], preferred_element_type=jnp.float32)
        + b_ref[...].astype(jnp.float32)
    ).astype(o_ref.dtype)


def _linear_kernel_acc(x_ref, w_ref, b_ref, o_ref, acc_ref, *, k_axis):
    """K-tiled case: f32 accumulator over the (last) K grid axis."""
    k = pl.program_id(k_axis)

    @pl.when(k == 0)
    def _():
        acc_ref[...] = jnp.zeros_like(acc_ref)

    acc_ref[...] += jnp.dot(x_ref[...], w_ref[...],
                            preferred_element_type=jnp.float32)

    @pl.when(k == pl.num_programs(k_axis) - 1)
    def _():
        o_ref[...] = (acc_ref[...] + b_ref[...].astype(jnp.float32)
                      ).astype(o_ref.dtype)


# ---------------------------------------------------------------------------
# shared-linear path
# ---------------------------------------------------------------------------
def _shared_head(x2d, w, b, out_dtype, compute_dtype):
    """x2d: (M, K); w: (K, N); b: (N,)  ->  (M, N)."""
    M, K = x2d.shape
    N = w.shape[-1]
    itemsize = jnp.dtype(compute_dtype or x2d.dtype).itemsize

    n_pad = _round_up(N, 128)                  # lane-dense output columns
    tn = _pick_tile_128(n_pad, 512)
    tm = M if M <= 256 else 256                # full-dim escape when small

    # Budget double-buffered (x + w) blocks to ~12 MiB before picking tk.
    k_cap = 2048
    while k_cap > 256 and 2 * (tm * k_cap + k_cap * tn) * itemsize > 12 * 1024 * 1024:
        k_cap //= 2
    tk, k_pad = _pick_k_tile(K, k_cap)

    if k_pad != K:                             # rare fallback only (weird nf)
        x2d = jnp.pad(x2d, ((0, 0), (0, k_pad - K)))
    wp = jnp.pad(w, ((0, k_pad - K), (0, n_pad - N)))
    bp = jnp.pad(b.reshape(1, N), ((0, 0), (0, n_pad - N)))

    if compute_dtype is not None:
        x2d = x2d.astype(compute_dtype)
        wp = wp.astype(compute_dtype)

    grid_m = _cdiv(M, tm)
    grid_n = n_pad // tn
    grid_k = k_pad // tk

    # v7x megacore: guarantee >= 2 parallel blocks for tiny heads.
    if grid_m == 1 and grid_n == 1 and M >= 16:
        tm = _round_up(_cdiv(M, 2), 8)
        grid_m = _cdiv(M, tm)

    # Grid ordering: the operand whose block index ignores the *inner*
    # parallel axis is fetched once per outer step; order so the bigger
    # re-fetch cost is avoided.
    w_refetch = (grid_m - 1) * k_pad * n_pad   # cost if N is the inner axis
    x_refetch = (grid_n - 1) * M * k_pad       # cost if M is the inner axis
    m_outer = w_refetch <= x_refetch

    if grid_k == 1:
        kernel = _linear_kernel
        scratch = []
        dims = ("parallel", "parallel")
        if m_outer:
            grid = (grid_m, grid_n)
            x_map = lambda i, j: (i, 0)
            w_map = lambda i, j: (0, j)
            b_map = lambda i, j: (0, j)
            o_map = lambda i, j: (i, j)
        else:
            grid = (grid_n, grid_m)
            x_map = lambda j, i: (i, 0)
            w_map = lambda j, i: (0, j)
            b_map = lambda j, i: (0, j)
            o_map = lambda j, i: (i, j)
    else:
        kernel = functools.partial(_linear_kernel_acc, k_axis=2)
        scratch = [pltpu.VMEM((tm, tn), jnp.float32)]
        dims = ("parallel", "parallel", "arbitrary")
        if m_outer:
            grid = (grid_m, grid_n, grid_k)
            x_map = lambda i, j, k: (i, k)
            w_map = lambda i, j, k: (k, j)
            b_map = lambda i, j, k: (0, j)
            o_map = lambda i, j, k: (i, j)
        else:
            grid = (grid_n, grid_m, grid_k)
            x_map = lambda j, i, k: (i, k)
            w_map = lambda j, i, k: (k, j)
            b_map = lambda j, i, k: (0, j)
            o_map = lambda j, i, k: (i, j)

    out = pl.pallas_call(
        kernel,
        out_shape=jax.ShapeDtypeStruct((M, n_pad), out_dtype),
        grid_spec=pltpu.PrefetchScalarGridSpec(
            num_scalar_prefetch=0,
            grid=grid,
            in_specs=[
                pl.BlockSpec((tm, tk), x_map),
                pl.BlockSpec((tk, tn), w_map),
                pl.BlockSpec((1, tn), b_map),
            ],
            out_specs=pl.BlockSpec((tm, tn), o_map),
            scratch_shapes=scratch,
        ),
        compiler_params=pltpu.CompilerParams(
            dimension_semantics=dims,
            vmem_limit_bytes=32 * 1024 * 1024),
    )(x2d, wp, bp)

    return out if n_pad == N else out[:, :N]


# ---------------------------------------------------------------------------
# per-variable (individual) path
# ---------------------------------------------------------------------------
def _individual_head(x3, w, b, out_dtype, compute_dtype):
    """x3: (bs, n_vars, K); w: (n_vars, K, N); b: (n_vars, N) -> (bs, n_vars, N)."""
    B, V, K = x3.shape
    N = w.shape[-1]
    itemsize = jnp.dtype(compute_dtype or x3.dtype).itemsize

    n_pad = _round_up(N, 128)                  # lane-dense per-variable slab
    tn = _pick_tile_128(n_pad, 512)
    bm = B if B <= 256 else 256

    # Per-variable K slab must be a multiple of 128 so the flattened-2D column
    # arithmetic lands exactly on each variable's columns; pad only if needed.
    if K % 128 == 0:
        k_dim = K
        x2d = x3.reshape(B, V * K)             # contiguous view, no copy
    else:
        k_dim = _round_up(K, 128)              # rare fallback: pad per-var K
        x2d = jnp.pad(x3, ((0, 0), (0, 0), (0, k_dim - K))).reshape(B, V * k_dim)

    k_cap = 2048
    while k_cap > 256 and 2 * (bm * k_cap + k_cap * tn) * itemsize > 12 * 1024 * 1024:
        k_cap //= 2
    tk = k_dim if k_dim <= k_cap else _pick_tile_128(k_dim, k_cap)

    # Weight/bias flattened to 2-D so the same kernels as the shared path run.
    wp = jnp.pad(w, ((0, 0), (0, k_dim - K), (0, n_pad - N))).reshape(V * k_dim, n_pad)
    bp = jnp.pad(b, ((0, 0), (0, n_pad - N))).reshape(1, V * n_pad)

    if compute_dtype is not None:
        x2d = x2d.astype(compute_dtype)
        wp = wp.astype(compute_dtype)

    grid_b = _cdiv(B, bm)
    grid_n = n_pad // tn
    grid_k = k_dim // tk
    kb = k_dim // tk                           # K blocks per variable
    nb = n_pad // tn                           # N blocks per variable

    if grid_k == 1:
        kernel = _linear_kernel
        scratch = []
        dims = ("parallel", "parallel", "parallel")
        w_refetch = (grid_b - 1) * V * k_dim * n_pad
        x_refetch = (grid_n - 1) * B * V * k_dim
        if w_refetch <= x_refetch:
            grid = (V, grid_b, grid_n)         # N inner: x reused across N tiles
            x_map = lambda v, i, j: (i, v * kb)
            w_map = lambda v, i, j: (v * kb, j)
            b_map = lambda v, i, j: (0, v * nb + j)
            o_map = lambda v, i, j: (i, v * nb + j)
        else:
            grid = (V, grid_n, grid_b)         # M inner: w reused across M tiles
            x_map = lambda v, j, i: (i, v * kb)
            w_map = lambda v, j, i: (v * kb, j)
            b_map = lambda v, j, i: (0, v * nb + j)
            o_map = lambda v, j, i: (i, v * nb + j)
    else:
        kernel = functools.partial(_linear_kernel_acc, k_axis=3)
        scratch = [pltpu.VMEM((bm, tn), jnp.float32)]
        dims = ("parallel", "parallel", "parallel", "arbitrary")
        grid = (V, grid_b, grid_n, grid_k)
        x_map = lambda v, i, j, k: (i, v * kb + k)
        w_map = lambda v, i, j, k: (v * kb + k, j)
        b_map = lambda v, i, j, k: (0, v * nb + j)
        o_map = lambda v, i, j, k: (i, v * nb + j)

    out = pl.pallas_call(
        kernel,
        out_shape=jax.ShapeDtypeStruct((B, V * n_pad), out_dtype),
        grid_spec=pltpu.PrefetchScalarGridSpec(
            num_scalar_prefetch=0,
            grid=grid,
            in_specs=[
                pl.BlockSpec((bm, tk), x_map),
                pl.BlockSpec((tk, tn), w_map),
                pl.BlockSpec((1, tn), b_map),
            ],
            out_specs=pl.BlockSpec((bm, tn), o_map),
            scratch_shapes=scratch,
        ),
        compiler_params=pltpu.CompilerParams(
            dimension_semantics=dims,
            vmem_limit_bytes=32 * 1024 * 1024),
    )(x2d, wp, bp)

    out = out.reshape(B, V, n_pad)             # natural layout, no transpose
    return out if n_pad == N else out[:, :, :N]


# ---------------------------------------------------------------------------
# public forward
# ---------------------------------------------------------------------------
@functools.partial(jax.jit, static_argnames=("individual", "compute_dtype"))
def flatten_head_forward(x, weights, biases, *, individual, compute_dtype=None):
    """Forward pass of Flatten_Head.

    x:       [bs, n_vars, d_model, patch_num]
    weights: [n_vars, nf, target_window]  (individual=True)
             [nf, target_window]          (individual=False, shared)
    biases:  [n_vars, target_window] or [target_window]
    returns: [bs, n_vars, target_window]

    compute_dtype: optional (e.g. jnp.bfloat16) to halve DMA bytes; matmul
    still accumulates in float32 and the output keeps x.dtype.
    """
    bs, n_vars, d_model, patch_num = x.shape
    nf = d_model * patch_num
    # TODO(synk): head_dropout is identity at p=0 / eval mode; not emitted.

    if individual:
        tw = weights.shape[-1]
        x3 = x.reshape(bs, n_vars, nf)                 # contiguous flatten
        return _individual_head(x3, weights, biases.reshape(n_vars, tw),
                                x.dtype, compute_dtype)
    else:
        tw = weights.shape[-1]
        x2d = x.reshape(bs * n_vars, nf)               # contiguous flatten
        out2d = _shared_head(x2d, weights, biases.reshape(tw),
                             x.dtype, compute_dtype)
        return out2d.reshape(bs, n_vars, tw)


# ---------------------------------------------------------------------------
# reference + test
# ---------------------------------------------------------------------------
def _reference(x, weights, biases, individual):
    bs, n_vars, d_model, patch_num = x.shape
    nf = d_model * patch_num
    xf = x.reshape(bs, n_vars, nf)
    if individual:
        return jnp.einsum("bvn,vnt->bvt", xf, weights) + biases[None, :, :]
    else:
        return jnp.einsum("bvn,nt->bvt", xf, weights) + biases[None, None, :]


if __name__ == "__main__":
    # Small, module-consistent shapes.
    bs = 2
    n_vars = 4
    d_model = 16
    patch_num = 8
    nf = d_model * patch_num          # 128
    target_window = 24

    key = jax.random.PRNGKey(0)
    kx, kw, kb = jax.random.split(key, 3)

    x = jax.random.normal(kx, (bs, n_vars, d_model, patch_num),
                          dtype=jnp.float32)

    # Deterministic parameter init (nn.Linear-style uniform bound 1/sqrt(nf)).
    bound = 1.0 / (nf ** 0.5)
    weights = jax.random.uniform(
        kw, (n_vars, nf, target_window), minval=-bound, maxval=bound,
        dtype=jnp.float32)
    biases = jax.random.uniform(
        kb, (n_vars, target_window), minval=-bound, maxval=bound,
        dtype=jnp.float32)

    # individual=True (per-variable linears)
    out = jax.block_until_ready(
        flatten_head_forward(x, weights, biases, individual=True))
    ref = _reference(x, weights, biases, True)
    assert out.shape == (bs, n_vars, target_window), out.shape
    assert jnp.allclose(out, ref, atol=1e-4, rtol=1e-4), float(
        jnp.max(jnp.abs(out - ref)))

    # individual=False (single shared linear)
    w_shared = weights[0]
    b_shared = biases[0]
    out_s = jax.block_until_ready(
        flatten_head_forward(x, w_shared, b_shared, individual=False))
    ref_s = _reference(x, w_shared, b_shared, False)
    assert out_s.shape == (bs, n_vars, target_window), out_s.shape
    assert jnp.allclose(out_s, ref_s, atol=1e-4, rtol=1e-4), float(
        jnp.max(jnp.abs(out_s - ref_s)))

    print("KERNEL_OK")
</pallas_src>

<mosaic_0001>
module attributes {stable_mosaic.version = 11 : i64} {
  func.func @_linear_kernel(%arg0: i32, %arg1: i32, %arg2: i32, %arg3: memref<2x128xf32, #tpu.memory_space<vmem>>, %arg4: memref<128x128xf32, #tpu.memory_space<vmem>>, %arg5: memref<1x128xf32, #tpu.memory_space<vmem>>, %arg6: memref<2x128xf32, #tpu.memory_space<vmem>>) attributes {dimension_semantics = [#tpu.dimension_semantics<parallel>, #tpu.dimension_semantics<parallel>, #tpu.dimension_semantics<parallel>], iteration_bounds = array<i64: 4, 1, 1>, scalar_prefetch = 0 : i64, scratch_operands = 0 : i64, tpu.core_type = #tpu.core_type<tc>, window_params = [{transform_indices = @transform_0, window_bounds = array<i64: 2, 128>}, {transform_indices = @transform_1, window_bounds = array<i64: 128, 128>}, {transform_indices = @transform_2, window_bounds = array<i64: 1, 128>}, {transform_indices = @transform_3, window_bounds = array<i64: 2, 128>}]} {
    %c0 = arith.constant 0 : index
    %c0_0 = arith.constant 0 : index
    %0 = vector.load %arg3[%c0, %c0_0] : memref<2x128xf32, #tpu.memory_space<vmem>>, vector<2x128xf32>
    %c0_1 = arith.constant 0 : index
    %c0_2 = arith.constant 0 : index
    %1 = vector.load %arg4[%c0_1, %c0_2] : memref<128x128xf32, #tpu.memory_space<vmem>>, vector<128x128xf32>
    %cst = arith.constant dense<0.000000e+00> : vector<2x128xf32>
    %2 = tpu.matmul %0, %1, %cst {dimension_numbers = #tpu.dot_dimension_numbers<[1], [0], [0], [1], [0, 0, 1, 1], [], []>} : vector<2x128xf32>, vector<128x128xf32>, vector<2x128xf32> -> vector<2x128xf32>
    %c0_3 = arith.constant 0 : index
    %c0_4 = arith.constant 0 : index
    %3 = vector.load %arg5[%c0_3, %c0_4] : memref<1x128xf32, #tpu.memory_space<vmem>>, vector<1x128xf32>
    %4 = vector.broadcast %3 : vector<1x128xf32> to vector<2x128xf32>
    %5 = arith.addf %2, %4 : vector<2x128xf32>
    %c0_5 = arith.constant 0 : index
    %c0_6 = arith.constant 0 : index
    %6 = vector.load %arg6[%c0_5, %c0_6] : memref<2x128xf32, #tpu.memory_space<vmem>>, vector<2x128xf32>
    tpu.vector_store %arg6[%c0_5, %c0_6], %5 {strides = array<i32>} : memref<2x128xf32, #tpu.memory_space<vmem>>, vector<2x128xf32>,
    return
  }
  func.func @transform_0(%arg0: i32, %arg1: i32, %arg2: i32) -> (i32, i32) {
    %c1_i32 = arith.constant 1 : i32
    %0 = arith.muli %arg0, %c1_i32 : i32
    %c0_i32 = arith.constant 0 : i32
    return %arg1, %0 : i32, i32
  }
  func.func @transform_1(%arg0: i32, %arg1: i32, %arg2: i32) -> (i32, i32) {
    %c1_i32 = arith.constant 1 : i32
    %0 = arith.muli %arg0, %c1_i32 : i32
    %c0_i32 = arith.constant 0 : i32
    return %0, %arg2 : i32, i32
  }
  func.func @transform_2(%arg0: i32, %arg1: i32, %arg2: i32) -> (i32, i32) {
    %c1_i32 = arith.constant 1 : i32
    %0 = arith.muli %arg0, %c1_i32 : i32
    %1 = arith.addi %0, %arg2 : i32
    %c0_i32 = arith.constant 0 : i32
    %c0_i32_0 = arith.constant 0 : i32
    return %c0_i32, %1 : i32, i32
  }
  func.func @transform_3(%arg0: i32, %arg1: i32, %arg2: i32) -> (i32, i32) {
    %c1_i32 = arith.constant 1 : i32
    %0 = arith.muli %arg0, %c1_i32 : i32
    %1 = arith.addi %0, %arg2 : i32
    %c0_i32 = arith.constant 0 : i32
    return %arg1, %1 : i32, i32
  }
}

</mosaic_0001>

<bundles_post_ra>
// kernel: flatten_head_forward.1
= control target key start
LH: loop header
LB: loop body
LE: loop exit
PB: predicated region body
PF: predicated region fallthrough
CT: control target
= control target key end

     0   :  { %s613_s12 = smov 0   ;;  %s615_s13 = smov 0   ;;  %s675_s0 = inlined_call_operand.vmem [shape: f32[2,512], index: 0, kind: input, shape index: {}]   ;;  %s676_s1 = inlined_call_operand.vmem [shape: f32[512,128], index: 1, kind: input, shape index: {}]   ;;  %s677_s2 = inlined_call_operand.vmem [shape: f32[1,512], index: 2, kind: input, shape index: {}]   ;;  %s678_s3 = inlined_call_operand.vmem [shape: f32[2,512], index: 3, kind: output, shape index: {}]  }
   0x1   :  { %s617_s14 = smov 0  }
   0x2 LB: > { %s32_s15 = sadd.s32 1, %s585_s13  ;;  %p481_p0 = scmp.ge.s32.totalorder %s589_s14, 1  ;;  %s589_s14 = sphi %s617_s14, %s13_s14   ;;  %s585_s13 = sphi %s615_s13, %s680_s13   ;;  %s581_s12 = sphi %s613_s12, %s679_s12  }
   0x3   : > { %p34_p1 = scmp.ge.s32.totalorder %s32_s15, 4  ;;  %p193_p2 = scmp.lt.s32.totalorder %s589_s14, 5 }
   0x5   : > { %s682_s15 = smov (%p34_p1, %s32_s15), 0  ;;  %p194_p3 = pnand %p481_p0, %p193_p2 }
   0x6   : > { %s483_s16 = sshll.u32 (!%p194_p3), %s581_s12, 4  ;;  %p238_p5 = scmp.lt.s32.totalorder (!%p194_p3), %s581_s12, 3 }
   0x7   : > { %197 = sbr.rel (%p194_p3) target bundleno = 243 (0xf3), region = 32  ;;  %p245_p4 = scmp.lt.s32.totalorder (!%p194_p3), %s483_s16, 63 }
   0xc   : > { %v591_v0 = vmov 0.0   ;;  %vm592_vm0 = vmmov 0   ;;  %s684_s16 = smov (!%p245_p4, %s483_s16), 63  ;;  %s686_s12 = smov (!%p238_p5, %s581_s12), 3 }
   0xd   : > { %506 = vmatprep.subr.mxu0 %v591_v0  ;;  %538 = vmatprep.mubr.msk.f32.mxu0 %vm592_vm0, %v591_v0  ;;  %s484_s17 = sshll.u32 %s684_s16, 3  ;;  %s482_s21 = sshll.u32 %s686_s12, 1 }
   0xe   : > { %s637_s20 = scalar_lea.vmem %s676_s1, %s484_s17  ;;  %s243_s24 = scalar_lea.vmem %s675_s0, %s482_s21 }
   0xf   : > { %v284_v1 = vld [vmem:[%s637_s20 + $0x78] sm:$0xff]  ;;  %v283_v2 = vld [vmem:[%s637_s20 + $0x70] sm:$0xff]  ;;  %v282_v3 = vld [vmem:[%s637_s20 + $0x68] sm:$0xff]  ;;  %s256_s27 = scalar_lea.vmem %s677_s2, %s686_s12  ;;  %s266_s30 = scalar_lea.vmem %s678_s3, %s482_s21 }
  0x10   : > { %507 = vmatpush3.msra.mxu0 %v284_v1  ;;  %v281_v4 = vld [vmem:[%s637_s20 + $0x60] sm:$0xff]  ;;  %v280_v5 = vld [vmem:[%s637_s20 + $0x58] sm:$0xff]  ;;  %v279_v6 = vld [vmem:[%s637_s20 + $0x50] sm:$0xff] }
  0x11   : > { %508 = vmatprep.subr.mxu0 %v591_v0  ;;  %v278_v7 = vld [vmem:[%s637_s20 + $0x48] sm:$0xff]  ;;  %v277_v8 = vld [vmem:[%s637_s20 + $0x40] sm:$0xff]  ;;  %v276_v9 = vld [vmem:[%s637_s20 + $0x38] sm:$0xff] }
  0x12   : > { %509 = vmatpush3.msra.mxu0 %v283_v2  ;;  %v275_v10 = vld [vmem:[%s637_s20 + $0x30] sm:$0xff]  ;;  %v274_v11 = vld [vmem:[%s637_s20 + $0x28] sm:$0xff]  ;;  %v273_v12 = vld [vmem:[%s637_s20 + $0x20] sm:$0xff] }
  0x13   : > { %510 = vmatprep.subr.mxu0 %v591_v0  ;;  %v272_v13 = vld [vmem:[%s637_s20 + $0x18] sm:$0xff]  ;;  %v271_v14 = vld [vmem:[%s637_s20 + $0x10] sm:$0xff]  ;;  %v270_v15 = vld [vmem:[%s637_s20 + $0x8] sm:$0xff] }
  0x14   : > { %511 = vmatpush3.msra.mxu0 %v282_v3  ;;  %v269_v16 = vld [vmem:[%s637_s20] sm:$0xff] }
  0x15   : > { %512 = vmatprep.subr.mxu0 %v591_v0  ;;  %v268_v17 = vld [vmem:[%s243_s24] sm:$0x3] }
  0x16   : > { %513 = vmatpush3.msra.mxu0 %v281_v4  ;;  %v486_v18 = vld [vmem:[%s256_s27] ss:$0 sm:$0xff] }
  0x17   : > { %514 = vmatprep.subr.mxu0 %v591_v0 }
  0x18   : > { %515 = vmatpush3.msra.mxu0 %v280_v5 }
  0x19   : > { %516 = vmatprep.subr.mxu0 %v591_v0 }
  0x1a   : > { %517 = vmatpush3.msra.mxu0 %v279_v6 }
  0x1b   : > { %518 = vmatprep.subr.mxu0 %v591_v0 }
  0x1c   : > { %519 = vmatpush3.msra.mxu0 %v278_v7 }
  0x1d   : > { %520 = vmatprep.subr.mxu0 %v591_v0 }
  0x1e   : > { %521 = vmatpush3.msra.mxu0 %v277_v8 }
  0x1f   : > { %522 = vmatprep.subr.mxu0 %v591_v0 }
  0x20   : > { %523 = vmatpush3.msra.mxu0 %v276_v9 }
  0x21   : > { %524 = vmatprep.subr.mxu0 %v591_v0 }
  0x22   : > { %525 = vmatpush3.msra.mxu0 %v275_v10 }
  0x23   : > { %526 = vmatprep.subr.mxu0 %v591_v0 }
  0x24   : > { %527 = vmatpush3.msra.mxu0 %v274_v11 }
  0x25   : > { %528 = vmatprep.subr.mxu0 %v591_v0 }
  0x26   : > { %529 = vmatpush3.msra.mxu0 %v273_v12 }
  0x27   : > { %530 = vmatprep.subr.mxu0 %v591_v0 }
  0x28   : > { %531 = vmatpush3.msra.mxu0 %v272_v13 }
  0x29   : > { %532 = vmatprep.subr.mxu0 %v591_v0 }
  0x2a   : > { %533 = vmatpush3.msra.mxu0 %v271_v14 }
  0x2b   : > { %534 = vmatprep.subr.mxu0 %v591_v0 }
  0x2c   : > { %535 = vmatpush3.msra.mxu0 %v270_v15 }
  0x2d   : > { %536 = vmatprep.subr.mxu0 %v591_v0 }
  0x2e   : > { %537 = vmatpush3.msra.mxu0 %v269_v16 }
  0x2f   : > { %539 = vmatmul.mubr.f32.vlgmr.msra.gmra.mxu0 %v268_v17 }
  0xef   : > { %v358_v19 = vpop.f32.mrf.mxu0 }
  0xf0   : > { %v359_v20 = vadd.f32 %v486_v18, %v358_v19 }
  0xf1   : > { %v540_v21 = vpop.f32.mrf.mxu0 }
  0xf2   : > { %362 = vst [vmem:[%s266_s30] sm:$0x3] %v359_v20 }
  0xf3 PF: > { %s13_s14 = sadd.s32 1, %s589_s14   ;;  %s679_s12 = smov %s585_s13 }
  0xf4   : > { %p10_p6 = scmp.ge.s32.totalorder %s13_s14, 6   ;;  %s680_s13 = smov %s682_s15 }
  0xf6   :  { %12 = sbr.rel (!%p10_p6) target bundleno = 2 (0x2), region = 68 }

</bundles_post_ra>
